<compile_context>
chip_gen: v5e
topology: v5e:2x2
jax: 0.10.0
libtpu: 0.0.40
codegen_flags: <defaults>
</compile_context>

<pallas_src>
import functools

import jax
import jax.numpy as jnp
from jax.experimental import pallas as pl
from jax.experimental.pallas import tpu as pltpu

EPS = 1e-5  # PyTorch nn.GroupNorm default eps


def _prenorm_kernel(x_ref, gamma_ref, beta_ref, o_ref, *, inv_n, fn):
    # x_ref block: (1, C, H*W)  -> H*W on the lane axis (lane dense).
    x = x_ref[0].astype(jnp.float32)                      # (C, HW)

    # GroupNorm with a single group: statistics over ALL of (C, H, W).
    mean = jnp.sum(x) * inv_n                             # scalar
    centered = x - mean
    var = jnp.sum(centered * centered) * inv_n            # biased variance
    y = centered * jax.lax.rsqrt(var + EPS)

    # Per-channel affine, broadcast along the lane (H*W) axis.
    y = y * gamma_ref[...] + beta_ref[...]                # (C,1) * (C,HW) + (C,1)

    # Fused fn (must be elementwise / shape-preserving and JAX-traceable).
    o_ref[0] = fn(y).astype(o_ref.dtype)


def prenorm_forward(x_nchw, gamma, beta, fn=None):
    """x_nchw: (B, C, H, W); gamma/beta: (C,).  Returns fn(GroupNorm1(x))."""
    if fn is None:
        fn = lambda y: y
    B, C, H, W = x_nchw.shape
    HW = H * W

    x = x_nchw.reshape(B, C, HW).astype(jnp.float32)      # lane-dense layout
    gamma2 = gamma.reshape(C, 1).astype(jnp.float32)
    beta2 = beta.reshape(C, 1).astype(jnp.float32)

    out = pl.pallas_call(
        functools.partial(_prenorm_kernel, inv_n=1.0 / float(C * HW), fn=fn),
        out_shape=jax.ShapeDtypeStruct((B, C, HW), jnp.float32),
        grid=(B,),
        in_specs=[
            pl.BlockSpec((1, C, HW), lambda b: (b, 0, 0)),
            pl.BlockSpec((C, 1), lambda b: (0, 0)),
            pl.BlockSpec((C, 1), lambda b: (0, 0)),
        ],
        out_specs=pl.BlockSpec((1, C, HW), lambda b: (b, 0, 0)),
        compiler_params=pltpu.CompilerParams(
            dimension_semantics=("parallel",)),
    )(x, gamma2, beta2)

    return out.reshape(B, C, H, W)


def _reference_forward(x, gamma, beta, fn):
    # pure-JAX reference: GroupNorm(1, C) then fn.
    B, C, H, W = x.shape
    xf = x.reshape(B, -1).astype(jnp.float32)
    mean = xf.mean(axis=1, keepdims=True)
    var = ((xf - mean) ** 2).mean(axis=1, keepdims=True)
    y = (xf - mean) * jax.lax.rsqrt(var + EPS)
    y = y.reshape(B, C, H, W)
    y = y * gamma.reshape(1, C, 1, 1) + beta.reshape(1, C, 1, 1)
    return fn(y)


if __name__ == "__main__":
    key = jax.random.PRNGKey(0)
    kx, kg, kb = jax.random.split(key, 3)

    B, C, H, W = 2, 8, 16, 16                             # small NCHW input
    x = jax.random.normal(kx, (B, C, H, W), jnp.float32)
    gamma = 1.0 + 0.1 * jax.random.normal(kg, (C,), jnp.float32)
    beta = 0.1 * jax.random.normal(kb, (C,), jnp.float32)

    fn = jax.nn.silu                                      # example `self.fn`

    out = prenorm_forward(x, gamma, beta, fn=fn)
    out = jax.block_until_ready(out)
    assert out.shape == (B, C, H, W)

    ref = _reference_forward(x, gamma, beta, fn)
    err = float(jnp.max(jnp.abs(out - ref)))
    assert err < 1e-4, f"max abs err {err}"

    print("KERNEL_OK")
</pallas_src>

<mosaic_0001>
module attributes {stable_mosaic.version = 11 : i64} {
  func.func @_prenorm_kernel(%arg0: i32, %arg1: memref<1x8x256xf32, #tpu.memory_space<vmem>>, %arg2: memref<8x1xf32, #tpu.memory_space<vmem>>, %arg3: memref<8x1xf32, #tpu.memory_space<vmem>>, %arg4: memref<1x8x256xf32, #tpu.memory_space<vmem>>) attributes {dimension_semantics = [#tpu.dimension_semantics<parallel>], iteration_bounds = array<i64: 2>, scalar_prefetch = 0 : i64, scratch_operands = 0 : i64, tpu.core_type = #tpu.core_type<tc>, window_params = [{transform_indices = @transform_0, window_bounds = array<i64: 1, 8, 256>}, {pipeline_mode = #tpu.pipeline_mode<synchronous>, transform_indices = @transform_1, window_bounds = array<i64: 8, 1>}, {pipeline_mode = #tpu.pipeline_mode<synchronous>, transform_indices = @transform_2, window_bounds = array<i64: 8, 1>}, {transform_indices = @transform_3, window_bounds = array<i64: 1, 8, 256>}]} {
    %c0 = arith.constant 0 : index
    %c0_0 = arith.constant 0 : index
    %c0_1 = arith.constant 0 : index
    %0 = vector.load %arg1[%c0, %c0_0, %c0_1] : memref<1x8x256xf32, #tpu.memory_space<vmem>>, vector<1x8x256xf32>
    %1 = vector.shape_cast %0 : vector<1x8x256xf32> to vector<8x256xf32>
    %2 = vector.shape_cast %1 : vector<8x256xf32> to vector<1x8x256xf32>
    %cst = arith.constant dense<0.000000e+00> : vector<1xf32>
    %3 = vector.multi_reduction <add>, %2, %cst [1, 2] : vector<1x8x256xf32> to vector<1xf32>
    %4 = vector.shape_cast %3 : vector<1xf32> to vector<1x1x1xf32>
    %5 = vector.extract %4[0, 0, 0] : f32 from vector<1x1x1xf32>
    %cst_2 = arith.constant 4.8828125E-4 : f32
    %6 = arith.mulf %5, %cst_2 : f32
    %7 = vector.broadcast %6 : f32 to vector<8x256xf32>
    %8 = arith.subf %1, %7 : vector<8x256xf32>
    %9 = arith.mulf %8, %8 : vector<8x256xf32>
    %10 = vector.shape_cast %9 : vector<8x256xf32> to vector<1x8x256xf32>
    %cst_3 = arith.constant dense<0.000000e+00> : vector<1xf32>
    %11 = vector.multi_reduction <add>, %10, %cst_3 [1, 2] : vector<1x8x256xf32> to vector<1xf32>
    %12 = vector.shape_cast %11 : vector<1xf32> to vector<1x1x1xf32>
    %13 = vector.extract %12[0, 0, 0] : f32 from vector<1x1x1xf32>
    %cst_4 = arith.constant 4.8828125E-4 : f32
    %14 = arith.mulf %13, %cst_4 : f32
    %cst_5 = arith.constant 9.99999974E-6 : f32
    %15 = arith.addf %14, %cst_5 : f32
    %16 = math.rsqrt %15 : f32
    %17 = vector.broadcast %16 : f32 to vector<8x256xf32>
    %18 = arith.mulf %8, %17 : vector<8x256xf32>
    %c0_6 = arith.constant 0 : index
    %c0_7 = arith.constant 0 : index
    %19 = vector.load %arg2[%c0_6, %c0_7] : memref<8x1xf32, #tpu.memory_space<vmem>>, vector<8x1xf32>
    %20 = vector.broadcast %19 : vector<8x1xf32> to vector<8x256xf32>
    %21 = arith.mulf %18, %20 : vector<8x256xf32>
    %c0_8 = arith.constant 0 : index
    %c0_9 = arith.constant 0 : index
    %22 = vector.load %arg3[%c0_8, %c0_9] : memref<8x1xf32, #tpu.memory_space<vmem>>, vector<8x1xf32>
    %23 = vector.broadcast %22 : vector<8x1xf32> to vector<8x256xf32>
    %24 = arith.addf %21, %23 : vector<8x256xf32>
    %25 = arith.negf %24 : vector<8x256xf32>
    %26 = math.exp %25 : vector<8x256xf32>
    %cst_10 = arith.constant 1.000000e+00 : f32
    %27 = vector.broadcast %cst_10 : f32 to vector<8x256xf32>
    %28 = arith.addf %27, %26 : vector<8x256xf32>
    %29 = arith.divf %27, %28 : vector<8x256xf32>
    %30 = arith.mulf %24, %29 : vector<8x256xf32>
    %c0_11 = arith.constant 0 : index
    %c0_12 = arith.constant 0 : index
    %c0_13 = arith.constant 0 : index
    %31 = vector.load %arg4[%c0_11, %c0_12, %c0_13] : memref<1x8x256xf32, #tpu.memory_space<vmem>>, vector<1x8x256xf32>
    %32 = vector.shape_cast %31 : vector<1x8x256xf32> to vector<8x256xf32>
    %33 = vector.shape_cast %30 : vector<8x256xf32> to vector<1x8x256xf32>
    tpu.vector_store %arg4[%c0_11, %c0_12, %c0_13], %33 {strides = array<i32>} : memref<1x8x256xf32, #tpu.memory_space<vmem>>, vector<1x8x256xf32>,
    return
  }
  func.func @transform_0(%arg0: i32) -> (i32, i32, i32) {
    %c0_i32 = arith.constant 0 : i32
    %c0_i32_0 = arith.constant 0 : i32
    %c0_i32_1 = arith.constant 0 : i32
    return %arg0, %c0_i32, %c0_i32_0 : i32, i32, i32
  }
  func.func @transform_1(%arg0: i32) -> (i32, i32) {
    %c0_i32 = arith.constant 0 : i32
    %c0_i32_0 = arith.constant 0 : i32
    %c0_i32_1 = arith.constant 0 : i32
    return %c0_i32, %c0_i32_0 : i32, i32
  }
  func.func @transform_2(%arg0: i32) -> (i32, i32) {
    %c0_i32 = arith.constant 0 : i32
    %c0_i32_0 = arith.constant 0 : i32
    %c0_i32_1 = arith.constant 0 : i32
    return %c0_i32, %c0_i32_0 : i32, i32
  }
  func.func @transform_3(%arg0: i32) -> (i32, i32, i32) {
    %c0_i32 = arith.constant 0 : i32
    %c0_i32_0 = arith.constant 0 : i32
    %c0_i32_1 = arith.constant 0 : i32
    return %arg0, %c0_i32, %c0_i32_0 : i32, i32, i32
  }
}

</mosaic_0001>

<bundles_post_ra>
// kernel: tpu_custom_call.1
= control target key start
LH: loop header
LB: loop body
LE: loop exit
PB: predicated region body
PF: predicated region fallthrough
CT: control target
= control target key end

     0   :  { %8 = vsyncpa [#allocation3], 0  ;;  %s718_s0 = inlined_call_operand.hbm [shape: f32[2,8,256], index: 0, kind: input, shape index: {}]   ;;  %s719_s1 = inlined_call_operand.vmem [shape: f32[8,1], index: 1, kind: input, shape index: {}]   ;;  %s720_s2 = inlined_call_operand.vmem [shape: f32[8,1], index: 2, kind: input, shape index: {}]   ;;  %s721_s3 = inlined_call_operand.hbm [shape: f32[2,8,256], index: 3, kind: output, shape index: {}]  }
   0x1   :  { %10 = vsyncpa [#allocation3 + $0x1], 0 }
   0x2   :  { %11 = vsyncpa [#allocation4], 0 }
   0x3   :  { %13 = vsyncpa [#allocation4 + $0x1], 0  ;;  %s581_s12 = smov 0   ;;  %s583_s13 = smov 0  }
   0x4   :  { %s585_s14 = smov 0   ;;  %s587_s15 = smov 0  }
   0x5 LB: > { %s602_s16 = sadd.s32 4294967295, %s558_s15   ;;  %s379_s17 = sadd.s32 4294967294, %s558_s15   ;;  %s558_s15 = sphi %s587_s15, %s731_s15   ;;  %s554_s14 = sphi %s585_s14, %s730_s14   ;;  %s550_s13 = sphi %s583_s13, %s729_s13   ;;  %s546_s12 = sphi %s581_s12, %s728_s12  }
   0x6   : > { %s606_s18 = sadd.s32 1, %s558_s15   ;;  %s26_s19 = sadd.s32 1, %s554_s14 }
   0x7   : > { %s23_s20 = ssub.s32 %s558_s15, %s606_s18  ;;  %p33_p0 = scmp.ne.s32.totalorder %s554_s14, %s550_s13 }
   0x8   : > { %p24_p1 = scmp.eq.s32.totalorder %s23_s20, 0  ;;  %p34_p2 = scmp.eq.s32.totalorder %s558_s15, 0 }
   0x9   : > { %p39_p3 = scmp.ne.s32.totalorder %s550_s13, %s546_s12  ;;  %p40_p4 = scmp.eq.s32.totalorder %s602_s16, 0 }
   0xa   : > { %s618_s21 = scalar_select %p24_p1, %s554_s14, %s26_s19  }
   0xb   : > { %p620_p5 = por %p34_p2, %p33_p0  ;;  %p624_p6 = por %p40_p4, %p39_p3 }
   0xc   : > { %p105_p7 = scmp.eq.s32.totalorder %s602_s16, 1  ;;  %p111_p8 = scmp.eq.s32.totalorder %s379_s17, 1 }
   0xd   : > { %p415_p10 = scmp.lt.s32.totalorder %s558_s15, 2  ;;  %s137_s26 = sand.u32 1, %s554_s14  }
   0xe   : > { %p631_p11 = por %p105_p7, %p33_p0  ;;  %p635_p12 = por %p111_p8, %p39_p3 }
   0xf   : > { %s395_s27 = sshll.u32 %s558_s15, 4  ;;  %s382_s28 = sshll.u32 %s137_s26, 4 }
  0x10   : > { %s146_s4 = scalar_lea.hbm %s718_s0, %s395_s27  ;;  %s141_s6 = scalar_lea.vmem [#allocation2], %s382_s28 }
  0x11   : > { %s148_s5 = sshll.u32 %s146_s4, 4  ;;  %s150_s7 = sshll.u32 %s141_s6, 4  ;;  %s149_s5 = int_to_ptr.hbm [resolvable:$true] %s148_s5  ;;  %s151_s7 = int_to_ptr.vmem [resolvable:$true] %s150_s7 }
  0x12   : > { %p646_p13 = pnand %p415_p10, %p620_p5  ;;  %p385_p0 = scmp.ge.s32.totalorder %s558_s15, 1 }
  0x13   : > { %p155_p1 = scmp.lt.s32.totalorder %s558_s15, 3  ;;  %s138_s9 = scalar_lea.sflag [#allocation3], %s137_s26 }
  0x14   : > { %s462_s10 = sshra.s32 %s149_s5, 4  ;;  %p466_p3 = pneg %p646_p13  ;;  %s463_s10 = int_to_ptr.hbm [resolvable:$true] %s462_s10 }
  0x15   : > { %s464_s11 = scalar_lea.hbm %s463_s10, 16  ;;  %s469_s20 = scalar_lea.hbm %s718_s0, 32 }
  0x16   : > { %p465_p2 = scmp.ne.s32.totalorder %s463_s10, %s464_s11  ;;  %p470_p5 = scmp.lt.s32.totalorder %s463_s10, %s718_s0 }
  0x17   : > { %p471_p8 = scmp.lt.s32.totalorder %s469_s20, %s464_s11 }
  0x18   : > { %p467_p4 = pnand %p466_p3, %p465_p2 }
  0x19   : > { %p472_p10 = por %p471_p8, %p470_p5 }
  0x1a   : > { %p468_p7 = pneg %p467_p4 }
  0x1c   : > { %p473_p9 = pnand %p472_p10, %p468_p7 }
  0x1e   : > { %476 = shalt.err (!%p473_p9)
}
  0x1f   : > { %410 = dma.hbm_to_vmem [thread:$0]  (!%p646_p13), %s149_s5, 256, %s151_s7, %s138_s9  }
  0x20   : > { %p156_p2 = pnand %p385_p0, %p155_p1 }
  0x21   : > { %s667_s26 = sand.u32 (!%p156_p2), 1, %s550_s13  }
  0x22   : > { %159 = sbr.rel (%p156_p2) target bundleno = 522 (0x20a), region = 32  ;;  %s386_s28 = sshll.u32 (!%p156_p2), %s667_s26, 4 }
  0x23   : > { %s162_s29 = scalar_lea.sflag (!%p156_p2), [#allocation3], %s667_s26  ;;  %s165_s30 = scalar_lea.vmem (!%p156_p2), [#allocation2], %s386_s28 }
  0x27   : > { %537 = dma.done.wait (%p624_p6), %s162_s29, 256  }
  0x28   : > { %539 = vsyncadd (%p624_p6), %s162_s29, 4294967040  ;;  %v189_v0 = vld [vmem:[%s165_s30] sm:$0xff]  ;;  %v190_v1 = vld [vmem:[%s165_s30 + $0x8] sm:$0xff]  ;;  %v560_v17 = vmov 0   ;;  %s396_s19 = sshll.u32 %s602_s16, 4  ;;  %s188_s16 = scalar_lea.vmem [#allocation5], %s386_s28 }
  0x29   : > { %v191_v2 = vadd.f32 %v190_v1, %v189_v0  ;;  %v234_v16 = vld [vmem:[%s719_s1] sm:$0xff]  ;;  %450 = vset.pattern.permute.xlu1 %v560_v17  ;;  %451 = vset.pattern.permute.xlu0 %v560_v17  ;;  %s304_s27 = scalar_lea.hbm %s721_s3, %s396_s19  ;;  %s306_s29 = sshll.u32 %s188_s16, 4  ;;  %s307_s29 = int_to_ptr.vmem [resolvable:$true] %s306_s29 }
  0x2a   : > { %237 = vperm.xlu1 %450, %v234_v16   ;;  %v242_v18 = vld [vmem:[%s720_s2] sm:$0xff]  ;;  %s308_s30 = sshll.u32 %s304_s27, 4  ;;  %s512_s7 = scalar_lea.hbm %s721_s3, 32  ;;  %s309_s30 = int_to_ptr.hbm [resolvable:$true] %s308_s30 }
  0x2b   : > { %192 = vadd.xlane.f32.xlu0 %v191_v2 }
  0x32   : > { %245 = vperm.xlu1 %450, %v242_v18  }
  0x9c   : > { %v238_v34 = vpop.permute.xlu1 %237 }
  0x9e   : > { %v193_v3 = vpop.xlane.xlu0 %192 }
  0x9f   : > { %v194_v4 = vrot.slane %v193_v3, 4 }
  0xa1   : > { %v195_v5 = vadd.f32 %v194_v4, %v193_v3 }
  0xa3   : > { %v196_v6 = vrot.slane %v195_v5, 2 }
  0xa4   : > { %v246_v40 = vpop.permute.xlu1 %245 }
  0xa5   : > { %v197_v7 = vadd.f32 %v196_v6, %v195_v5 }
  0xa7   : > { %v198_v8 = vrot.slane %v197_v7, 1 }
  0xa9   : > { %v199_v9 = vadd.f32 %v198_v8, %v197_v7 }
  0xab   : > { %397 = vpush %v199_v9 }
  0xdc   : > { %s398_s4 = spop %397 }
  0xdd   : > { %s201_s5 = smul.f32 0.00048828125, %s398_s4  ;;  %s293_s4 = scalar_lea.sflag [#allocation4], %s667_s26 }
  0xdf   : > { %v202_v10 = vstv %s201_s5  ;;  %s506_s5 = sshra.s32 %s309_s30, 4  ;;  %s507_s5 = int_to_ptr.hbm [resolvable:$true] %s506_s5 }
  0xe0   : > { %v203_v11 = vsub.f32 %v189_v0, %v202_v10  ;;  %v204_v12 = vsub.f32 %v190_v1, %v202_v10  ;;  %s508_s23 = scalar_lea.hbm %s507_s5, 16  ;;  %p513_p0 = scmp.lt.s32.totalorder %s507_s5, %s721_s3 }
  0xe1   : > { %p509_p6 = scmp.ne.s32.totalorder %s507_s5, %s508_s23  ;;  %p514_p1 = scmp.lt.s32.totalorder %s512_s7, %s508_s23 }
  0xe2   : > { %v205_v13 = vmul.f32 %v203_v11, %v203_v11  ;;  %v206_v14 = vmul.f32 %v204_v12, %v204_v12 }
  0xe3   : > { %p510_p9 = pnand %p509_p6, %p631_p11  ;;  %p515_p3 = por %p514_p1, %p513_p0 }
  0xe4   : > { %v207_v15 = vadd.f32 %v206_v14, %v205_v13 }
  0xe5   : > { %p511_p13 = pneg %p510_p9 }
  0xe6   : > { %208 = vadd.xlane.f32.xlu0 %v207_v15 }
  0xe7   : > { %p516_p4 = pnand %p515_p3, %p511_p13 }
 0x159   : > { %v209_v19 = vpop.xlane.xlu0 %208 }
 0x15a   : > { %v210_v20 = vrot.slane %v209_v19, 4 }
 0x15c   : > { %v211_v21 = vadd.f32 %v210_v20, %v209_v19 }
 0x15e   : > { %v212_v22 = vrot.slane %v211_v21, 2 }
 0x160   : > { %v213_v23 = vadd.f32 %v212_v22, %v211_v21 }
 0x162   : > { %v214_v24 = vrot.slane %v213_v23, 1 }
 0x164   : > { %v215_v25 = vadd.f32 %v214_v24, %v213_v23 }
 0x166   : > { %399 = vpush %v215_v25 }
 0x197   : > { %s400_s9 = spop %399 }
 0x198   : > { %s217_s10 = smul.f32 0.00048828125, %s400_s9 }
 0x19a   : > { %s218_s11 = sadd.f32 1e-05, %s217_s10 }
 0x19c   : > { %v219_v26 = vstv %s218_s11 }
 0x19d   : > { %452 = vrsqrt.f32 %v219_v26  ;;  %vm226_vm1 = vweird.f32 %v219_v26 }
 0x1a3   : > { %v453_v27 = vpop.eup %452 }
 0x1a4   : > { %v221_v28 = vmul.f32 %v453_v27, %v219_v26  ;;  %vm227_vm0 = vweird.f32 %v453_v27 }
 0x1a5   : > { %vm228_vm2 = vmor %vm226_vm1, %vm227_vm0 }
 0x1a6   : > { %v222_v29 = vmul.f32 %v453_v27, %v221_v28 }
 0x1a8   : > { %v223_v30 = vmul.f32 0.5, %v222_v29 }
 0x1aa   : > { %v224_v31 = vsub.f32 1.5, %v223_v30 }
 0x1ac   : > { %v225_v32 = vmul.f32 %v453_v27, %v224_v31 }
 0x1ae   : > { %v229_v33 = vsel %vm228_vm2, %v453_v27, %v225_v32 }
 0x1af   : > { %401 = vpush %v229_v33 }
 0x1e0   : > { %s402_s17 = spop %401 }
 0x1e1   : > { %v231_v35 = vstv %s402_s17 }
 0x1e2   : > { %v232_v36 = vmul.f32 %v231_v35, %v203_v11  ;;  %v233_v37 = vmul.f32 %v231_v35, %v204_v12 }
 0x1e4   : > { %v240_v38 = vmul.f32 %v238_v34, %v232_v36  ;;  %v241_v39 = vmul.f32 %v238_v34, %v233_v37 }
 0x1e6   : > { %v248_v41 = vadd.f32 %v246_v40, %v240_v38  ;;  %v249_v42 = vadd.f32 %v246_v40, %v241_v39 }
 0x1e8   : > { %v388_v43 = vmul.f32 -1.442695, %v248_v41  ;;  %v389_v44 = vmul.f32 -1.442695, %v249_v42 }
 0x1ea   : > { %454 = vpow2.f32 %v388_v43 }
 0x1eb   : > { %456 = vpow2.f32 %v389_v44 }
 0x1f0   : > { %v455_v45 = vpop.eup %454 }
 0x1f1   : > { %v457_v46 = vpop.eup %456  ;;  %v256_v47 = vadd.f32 1.0, %v455_v45 }
 0x1f2   : > { %v257_v48 = vadd.f32 1.0, %v457_v46 }
 0x1f3   : > { %458 = vrcp.f32 %v256_v47  ;;  %v269_v54 = vand.u32 2147483648, %v256_v47  ;;  %v267_v57 = vand.u32 2147483647, %v256_v47  ;;  %vm263_vm5 = vweird.f32 %v256_v47 }
 0x1f4   : > { %460 = vrcp.f32 %v257_v48  ;;  %v284_v58 = vand.u32 2147483648, %v257_v48  ;;  %v282_v60 = vand.u32 2147483647, %v257_v48  ;;  %vm278_vm7 = vweird.f32 %v257_v48 }
 0x1f5   : > { %v270_v62 = vor.u32 1.1754944e-38, %v269_v54  ;;  %vm268_vm8 = vcmp.eq.f32.partialorder %v267_v57, 8.507059e+37 }
 0x1f6   : > { %v285_v1 = vor.u32 1.1754944e-38, %v284_v58  ;;  %vm283_vm10 = vcmp.eq.f32.partialorder %v282_v60, 8.507059e+37 }
 0x1f9   : > { %v459_v49 = vpop.eup %458 }
 0x1fa   : > { %v461_v50 = vpop.eup %460  ;;  %v259_v51 = vmul.f32 %v459_v49, %v256_v47  ;;  %vm264_vm3 = vweird.f32 %v459_v49 }
 0x1fb   : > { %v274_v52 = vmul.f32 %v461_v50, %v257_v48  ;;  %vm279_vm4 = vweird.f32 %v461_v50  ;;  %vm265_vm6 = vmor %vm263_vm5, %vm264_vm3 }
 0x1fc   : > { %v260_v53 = vsub.f32 1.0, %v259_v51  ;;  %vm280_vm9 = vmor %vm278_vm7, %vm279_vm4 }
 0x1fd   : > { %v275_v55 = vsub.f32 1.0, %v274_v52 }
 0x1fe   : > { %v261_v56 = vmul.f32 %v459_v49, %v260_v53 }
 0x1ff   : > { %v276_v59 = vmul.f32 %v461_v50, %v275_v55 }
 0x200   : > { %v262_v61 = vadd.f32 %v459_v49, %v261_v56 }
 0x201   : > { %v277_v63 = vadd.f32 %v461_v50, %v276_v59 }
 0x202   : > { %v266_v0 = vsel %vm265_vm6, %v459_v49, %v262_v61 }
 0x203   : > { %v271_v2 = vsel %vm268_vm8, %v270_v62, %v266_v0  ;;  %v281_v3 = vsel %vm280_vm9, %v461_v50, %v277_v63 }
 0x204   : > { %v286_v4 = vsel %vm283_vm10, %v285_v1, %v281_v3  ;;  %v288_v5 = vmul.f32 %v271_v2, %v248_v41 }
 0x205   : > { %v289_v6 = vmul.f32 %v286_v4, %v249_v42 }
 0x206   : > { %290 = vst [vmem:[%s188_s16] sm:$0xff] %v288_v5 }
 0x207   : > { %291 = vst [vmem:[%s188_s16 + $0x8] sm:$0xff] %v289_v6 }
 0x208   : > { %519 = shalt.err (!%p516_p4)
}
 0x209   : > { %405 = dma.vmem_to_hbm [thread:$0]  (%p631_p11), %s307_s29, 256, %s309_s30, %s293_s4  }
 0x20a PF: > { %s320_s26 = sand.u32 1, %s546_s12   ;;  %p727_p7 = scmp.ge.s32.totalorder %s558_s15, 2 }
 0x20b   : > { %s321_s10 = scalar_lea.sflag [#allocation4], %s320_s26 }
 0x20c   : > { %p412_p5 = pnand %p727_p7, %p635_p12 }
 0x20e   : > { %p413_p8 = pneg %p412_p5 }
 0x210   : > { %541 = dma.done.wait (%p413_p8), %s321_s10, 256  }
 0x211   : > { %543 = vsyncadd (%p413_p8), %s321_s10, 4294967040  ;;  %p16_p10 = scmp.ge.s32.totalorder %s606_s18, 4   ;;  %s728_s12 = smov %s550_s13 }
 0x212   : > { %s729_s13 = smov %s554_s14  ;;  %s730_s14 = smov %s618_s21 }
 0x213   : > { %s731_s15 = smov %s606_s18  ;;  %18 = sbr.rel (!%p16_p10) target bundleno = 5 (0x5), region = 77 }
 0x218   :  { %327 = vsyncpa [#allocation3], 1 }
 0x219   :  { %329 = vsyncpa [#allocation3 + $0x1], 1 }
 0x21a   :  { %330 = vsyncpa [#allocation4], 1 }
 0x21b   :  { %332 = vsyncpa [#allocation4 + $0x1], 1 }

</bundles_post_ra>
